<compile_context>
chip_gen: v5e
topology: v5e:2x2
jax: 0.10.0
libtpu: 0.0.40
codegen_flags: <defaults>
</compile_context>

<pallas_src>
import jax
import jax.numpy as jnp
import numpy as np
from jax.experimental import pallas as pl
from jax.experimental.pallas import tpu as pltpu


# ----------------------------------------------------------------------------- helpers
def _round_up(x, m):
    return (x + m - 1) // m * m


_VOCAB_STRIP = 256  # in-tile strip width: count strip (n_rows, 256) f32 stays in vregs
                    # and aligns the MXU contraction (K) dimension.


def _usable_vmem_bytes():
    """Generation-aware scoped-VMEM cap: physical capacity minus headroom."""
    cap = 64 << 20                                    # conservative (v7x per-TC VMEM)
    try:
        info = pltpu.get_tpu_info()
        cap = int(getattr(info, "vmem_capacity_bytes", cap))
    except Exception:
        pass
    # ~48 MiB usable on 64 MiB parts (v7x), ~100 MiB on 128 MiB parts (v5e/v6e).
    return max(min(cap - (16 << 20), int(cap * 0.8)), 32 << 20)


def _fixed_vmem_bytes(Bp, Lmax, D, H1, H2):
    """Lane-padding-aware footprint of everything except the streamed table tile."""
    def padded(r, c, item=4):
        return _round_up(r, 8) * _round_up(c, 128) * item
    small = 2 * padded(2 * Bp, Lmax)                               # token ids + weights
    mlpw = (2 * padded(D, H1) + padded(1, H1) + padded(H1, H2) + padded(1, H2)
            + padded(H2, 128) + padded(1, 128))
    out = padded(Bp, 128)
    acc = padded(2 * Bp, D)
    return 2 * (small + mlpw + out) + acc            # inputs/outputs are double-buffered


def _choose_vocab_tile(V, D, emb_itemsize, usable_vmem, fixed_bytes):
    """Lane-aligned vocab tile: >= ~4 MiB of *real* table DMA per grid step,
    clamped by the double-buffered, lane-padded VMEM footprint."""
    row_hbm = D * emb_itemsize                       # actual DMA bytes per table row
    row_vmem = max(D, 128) * emb_itemsize            # lane-padded VMEM bytes per row
    target_dma = 4 << 20
    tv_dma = target_dma // row_hbm
    tile_budget = max(usable_vmem - fixed_bytes - (8 << 20), 4 << 20)
    tv_vmem = tile_budget // (2 * row_vmem)          # double-buffered table tile
    tv = int(max(_VOCAB_STRIP, min(tv_dma, tv_vmem)))
    tv = (tv // _VOCAB_STRIP) * _VOCAB_STRIP
    tv = min(tv, _round_up(V, _VOCAB_STRIP))
    return max(tv, _VOCAB_STRIP)


# ------------------------------------------------------------------------- MLP epilogue
def _mlp_head(sent, ctx, w1a_ref, w1b_ref, b1_ref, w2_ref, b2_ref, w3_ref, b3_ref,
              out_ref):
    """fc1/fc2/fc3 + ReLU head. Dropout (eval mode) is the identity.
    cat([sent, ctx], 1) @ W1 == sent @ W1[:D] + ctx @ W1[D:] (no lane concat)."""
    h1 = jnp.dot(sent, w1a_ref[...], preferred_element_type=jnp.float32)
    h1 = h1 + jnp.dot(ctx, w1b_ref[...], preferred_element_type=jnp.float32)
    h1 = jnp.maximum(h1 + b1_ref[...], 0.0)                        # (Bp, 256)
    h2 = jnp.dot(h1, w2_ref[...], preferred_element_type=jnp.float32) + b2_ref[...]
    h2 = jnp.maximum(h2, 0.0)                                      # (Bp, 128)
    out_ref[...] = (jnp.dot(h2, w3_ref[...], preferred_element_type=jnp.float32)
                    + b3_ref[...])                                 # (Bp, 128) lane-dense


# -------------------------------------------------------------------- streamed-table path
def _ecm_stream_kernel(tok_ref, wgt_ref, emb_ref,
                       w1a_ref, w1b_ref, b1_ref, w2_ref, b2_ref, w3_ref, b3_ref,
                       out_ref, acc_ref):
    """One grid step processes one (TV, D) vocab tile of the embedding table.

    tok_ref : (2*Bp, Lmax) int32  stacked [sentence ; context] token ids (-1 = pad)
    wgt_ref : (2*Bp, Lmax) f32    per-token weights (1.0 sentence, ctx_w context, 0 pad)
    emb_ref : (TV, D)             current embedding-table tile (bf16 or f32)
    acc_ref : (2*Bp, D)  f32      resident accumulator [sent_emd ; ctx_emd]
    out_ref : (Bp, 128)  f32      lane-dense logits (columns >= 2 are zero padding)
    """
    k = pl.program_id(0)
    nk = pl.num_programs(0)
    TV, D = emb_ref.shape
    n_rows, Lmax = tok_ref.shape
    Bp = out_ref.shape[0]
    SV = _VOCAB_STRIP
    n_strips = TV // SV

    @pl.when(k == 0)
    def _init():
        acc_ref[...] = jnp.zeros_like(acc_ref)

    toks = tok_ref[...]                                            # (2Bp, Lmax) i32
    wgts = wgt_ref[...]                                            # (2Bp, Lmax) f32
    tile_base = k * TV

    def strip_update(s, partial):
        # Strip-mined count build: the (n_rows, SV) count stays in vregs (no VMEM spill).
        off = s * SV
        if not isinstance(off, int):
            off = pl.multiple_of(off, SV)
        vids = tile_base + off + jax.lax.broadcasted_iota(jnp.int32, (1, SV), 1)
        cnt = jnp.zeros((n_rows, SV), jnp.float32)
        for l in range(Lmax):                        # Lmax is a tiny static constant
            cnt = cnt + jnp.where(toks[:, l:l + 1] == vids, wgts[:, l:l + 1], 0.0)
        emb_strip = emb_ref[pl.ds(off, SV), :].astype(jnp.float32)
        return partial + jnp.dot(cnt, emb_strip, preferred_element_type=jnp.float32)

    zero = jnp.zeros((n_rows, D), jnp.float32)
    if n_strips <= 8:                                # small tile: fully unrolled strips
        partial = zero
        for s in range(n_strips):
            partial = strip_update(s, partial)
    else:                                            # large tile: bounded code size
        partial = jax.lax.fori_loop(0, n_strips, strip_update, zero)

    acc_ref[...] += partial

    @pl.when(k == nk - 1)
    def _finish():
        _mlp_head(acc_ref[:Bp, :], acc_ref[Bp:, :],
                  w1a_ref, w1b_ref, b1_ref, w2_ref, b2_ref, w3_ref, b3_ref, out_ref)


def _forward_stream(sentence, context, params, mlp, B, Ls, Lc, V, D, Bp, *,
                    vocab_tile=None, table_bf16=True):
    H1, H2 = 256, 128
    W1a, W1b, b1, W2, b2, W3p, b3p = mlp
    Lmax = max(Ls, Lc)

    # Stack sentence & context ids / weights: rows [0:Bp) sentence, [Bp:2Bp) context.
    tok = jnp.full((2 * Bp, Lmax), -1, jnp.int32)          # -1 never matches a vocab id
    tok = tok.at[:B, :Ls].set(sentence.astype(jnp.int32))
    tok = tok.at[Bp:Bp + B, :Lc].set(context.astype(jnp.int32))
    wgt = jnp.zeros((2 * Bp, Lmax), jnp.float32)
    wgt = wgt.at[:B, :Ls].set(1.0)
    wgt = wgt.at[Bp:Bp + B, :Lc].set(
        jnp.broadcast_to(params["ctx_w"][None, :], (B, Lc)).astype(jnp.float32))

    table_dtype = jnp.bfloat16 if table_bf16 else jnp.float32
    itemsize = 2 if table_bf16 else 4

    usable_vmem = _usable_vmem_bytes()
    fixed = _fixed_vmem_bytes(Bp, Lmax, D, H1, H2)
    if vocab_tile is None:
        TV = _choose_vocab_tile(V, D, itemsize, usable_vmem, fixed)
    else:
        TV = min(_round_up(int(vocab_tile), _VOCAB_STRIP), _round_up(V, _VOCAB_STRIP))
    Vp = _round_up(V, TV)
    n_tiles = Vp // TV

    emb_p = jnp.zeros((Vp, D), jnp.float32).at[:V, :].set(params["emb"].astype(jnp.float32))
    emb_p = emb_p.astype(table_dtype)

    vmem_limit = int(min(usable_vmem,
                         max(fixed + 2 * TV * max(D, 128) * itemsize + (8 << 20),
                             32 << 20)))

    def const(shape):
        return pl.BlockSpec(shape, lambda k: (0, 0))

    return pl.pallas_call(
        _ecm_stream_kernel,
        out_shape=jax.ShapeDtypeStruct((Bp, 128), jnp.float32),
        grid=(n_tiles,),
        in_specs=[
            const((2 * Bp, Lmax)),                        # stacked token ids
            const((2 * Bp, Lmax)),                        # stacked token weights
            pl.BlockSpec((TV, D), lambda k: (k, 0)),      # table tile (pipelined stream)
            const((D, H1)), const((D, H1)), const((1, H1)),   # fc1 (split) + bias
            const((H1, H2)), const((1, H2)),                  # fc2 + bias
            const((H2, 128)), const((1, 128)),                # fc3 (lane-padded) + bias
        ],
        out_specs=const((Bp, 128)),
        scratch_shapes=[pltpu.VMEM((2 * Bp, D), jnp.float32)],
        compiler_params=pltpu.CompilerParams(
            dimension_semantics=("arbitrary",),           # vocab axis is a reduction
            vmem_limit_bytes=vmem_limit,
        ),
    )(tok, wgt, emb_p, W1a, W1b, b1, W2, b2, W3p, b3p)


# ---------------------------------------------------------------------- DMA-gather path
def _ecm_gather_kernel(ids_ref, selw_ref, emb_hbm,
                       w1a_ref, w1b_ref, b1_ref, w2_ref, b2_ref, w3_ref, b3_ref,
                       out_ref, gbuf, sem):
    """Gather only the needed embedding rows from HBM, then one MXU dot + MLP head.

    ids_ref : (n_tok_p,) int32 SMEM  (scalar-prefetched flat token ids; pads -> row 0)
    selw_ref: (2*Bp, n_tok_p) f32    selection/weight matrix built host-side
    emb_hbm : (V, D)                 full table, left in HBM (memory_space=pl.ANY)
    gbuf    : (n_tok_p, D) VMEM      gathered rows
    sem     : DMA semaphores, one per gathered row
    """
    n_tok = gbuf.shape[0]
    Bp = out_ref.shape[0]

    @pl.loop(0, n_tok)
    def _issue(t):                                   # issue all row gathers up front
        pltpu.make_async_copy(emb_hbm.at[ids_ref[t]], gbuf.at[t], sem.at[t]).start()

    @pl.loop(0, n_tok)
    def _collect(t):                                 # wait for every row
        pltpu.make_async_copy(emb_hbm.at[0], gbuf.at[t], sem.at[t]).wait()

    # One small MXU dot turns gathered rows into [sent_emd ; ctx_emd].
    acc = jnp.dot(selw_ref[...], gbuf[...].astype(jnp.float32),
                  preferred_element_type=jnp.float32)              # (2*Bp, D)
    _mlp_head(acc[:Bp, :], acc[Bp:, :],
              w1a_ref, w1b_ref, b1_ref, w2_ref, b2_ref, w3_ref, b3_ref, out_ref)


def _forward_gather(sentence, context, params, mlp, B, Ls, Lc, V, D, Bp):
    H1, H2 = 256, 128
    W1a, W1b, b1, W2, b2, W3p, b3p = mlp

    n_tok = B * (Ls + Lc)
    n_tok_p = _round_up(n_tok, 8)

    # Flat token ids: [all sentence tokens ; all context tokens ; pads -> id 0].
    flat_ids = jnp.zeros((n_tok_p,), jnp.int32)
    flat_ids = flat_ids.at[:B * Ls].set(sentence.reshape(-1).astype(jnp.int32))
    flat_ids = flat_ids.at[B * Ls:n_tok].set(context.reshape(-1).astype(jnp.int32))

    # Selection/weight matrix: row b sums its sentence tokens (weight 1.0),
    # row Bp+b sums its context tokens with ctx_w; pad columns get weight 0.
    col = jnp.arange(n_tok_p)
    rowb = jnp.arange(Bp)
    sent_owner = jnp.where(col < B * Ls, col // Ls, -1)
    sel_sent = (sent_owner[None, :] == rowb[:, None]).astype(jnp.float32)
    ccol = col - B * Ls
    is_ctx = (col >= B * Ls) & (col < n_tok)
    ctx_owner = jnp.where(is_ctx, ccol // Lc, -1)
    ctx_idx = jnp.where(is_ctx, ccol, 0) % Lc
    ctx_wvals = params["ctx_w"].astype(jnp.float32)[ctx_idx]
    sel_ctx = jnp.where(ctx_owner[None, :] == rowb[:, None], ctx_wvals[None, :], 0.0)
    selw = jnp.concatenate([sel_sent, sel_ctx], axis=0)            # (2*Bp, n_tok_p)

    emb = params["emb"].astype(jnp.float32)                        # stays in HBM

    grid_spec = pltpu.PrefetchScalarGridSpec(
        num_scalar_prefetch=1,
        grid=(1,),
        in_specs=[
            pl.BlockSpec((2 * Bp, n_tok_p), lambda i, ids: (0, 0)),   # selection weights
            pl.BlockSpec(memory_space=pl.ANY),                        # full table in HBM
            pl.BlockSpec((D, H1), lambda i, ids: (0, 0)),
            pl.BlockSpec((D, H1), lambda i, ids: (0, 0)),
            pl.BlockSpec((1, H1), lambda i, ids: (0, 0)),
            pl.BlockSpec((H1, H2), lambda i, ids: (0, 0)),
            pl.BlockSpec((1, H2), lambda i, ids: (0, 0)),
            pl.BlockSpec((H2, 128), lambda i, ids: (0, 0)),
            pl.BlockSpec((1, 128), lambda i, ids: (0, 0)),
        ],
        out_specs=pl.BlockSpec((Bp, 128), lambda i, ids: (0, 0)),
        scratch_shapes=[
            pltpu.VMEM((n_tok_p, D), jnp.float32),      # gathered rows
            pltpu.SemaphoreType.DMA((n_tok_p,)),        # one DMA sem per row
        ],
    )

    return pl.pallas_call(
        _ecm_gather_kernel,
        out_shape=jax.ShapeDtypeStruct((Bp, 128), jnp.float32),
        grid_spec=grid_spec,
        compiler_params=pltpu.CompilerParams(dimension_semantics=("arbitrary",)),
    )(flat_ids, selw, emb, W1a, W1b, b1, W2, b2, W3p, b3p)


# ------------------------------------------------------------------------- public wrapper
def _prep_mlp_params(params, D):
    H1, H2, OUT = 256, 128, 2
    W1 = params["W1"].astype(jnp.float32)
    W1a, W1b = W1[:D], W1[D:]
    b1 = params["b1"].reshape(1, H1).astype(jnp.float32)
    W2 = params["W2"].astype(jnp.float32)
    b2 = params["b2"].reshape(1, H2).astype(jnp.float32)
    W3p = jnp.zeros((H2, 128), jnp.float32).at[:, :OUT].set(params["W3"].astype(jnp.float32))
    b3p = jnp.zeros((1, 128), jnp.float32).at[:, :OUT].set(
        params["b3"].reshape(1, OUT).astype(jnp.float32))
    return W1a, W1b, b1, W2, b2, W3p, b3p


def embedding_context_modeler(sentence, context, params, *, mode="auto",
                              vocab_tile=None, table_bf16=True):
    """Eval-mode forward of EmbeddingContextModeler via a single pallas_call.

    mode: "gather" (DMA-gather of needed rows; best for large vocab / few tokens),
          "stream" (streamed table + strip-mined count matmul), or "auto".
    """
    B, Ls = sentence.shape
    _, Lc = context.shape
    V, D = params["emb"].shape
    OUT = 2
    Bp = _round_up(max(B, 8), 8)                    # sublane-dense batch (f32 sublanes)
    mlp = _prep_mlp_params(params, D)

    n_tok = B * (Ls + Lc)
    table_bytes = V * D * (2 if table_bf16 else 4)
    gather_bytes = n_tok * D * 4
    if mode == "auto":
        mode = "gather" if (table_bytes > 8 * gather_bytes and n_tok <= 4096) else "stream"

    if mode == "gather":
        out_p = _forward_gather(sentence, context, params, mlp, B, Ls, Lc, V, D, Bp)
    else:
        out_p = _forward_stream(sentence, context, params, mlp, B, Ls, Lc, V, D, Bp,
                                vocab_tile=vocab_tile, table_bf16=table_bf16)
    return out_p[:B, :OUT]


# ------------------------------------------------------------------------ params & reference
def init_params(key, vocab_size, embedding_dim, context_words):
    ks = jax.random.split(key, 5)
    emb = jax.random.normal(ks[0], (vocab_size, embedding_dim), jnp.float32)
    emb = emb.at[0].set(0.0)  # nn.Embedding(padding_idx=0)
    # WeightLayer.reset_parameters: uniform(0, 1/in_dim), bias=False
    ctx_w = jax.random.uniform(ks[1], (context_words,), jnp.float32,
                               0.0, 1.0 / context_words)

    def linear(k, fan_in, fan_out):
        bound = 1.0 / np.sqrt(fan_in)
        kw, kb = jax.random.split(k)
        W = jax.random.uniform(kw, (fan_in, fan_out), jnp.float32, -bound, bound)
        b = jax.random.uniform(kb, (fan_out,), jnp.float32, -bound, bound)
        return W, b

    W1, b1 = linear(ks[2], 2 * embedding_dim, 256)
    W2, b2 = linear(ks[3], 256, 128)
    W3, b3 = linear(ks[4], 128, 2)
    return dict(emb=emb, ctx_w=ctx_w, W1=W1, b1=b1, W2=W2, b2=b2, W3=W3, b3=b3)


def reference_forward(sentence, context, params):
    """Pure-JAX mirror of the PyTorch forward (eval mode; .squeeze() no-op for B>1)."""
    emb = params["emb"]
    sent_emd = jnp.sum(emb[sentence], axis=1)                       # (B, D)
    cont_emd = emb[context]                                         # (B, Lc, D)
    context_embed = jnp.sum(cont_emd * params["ctx_w"][None, :, None], axis=1)
    e = jnp.concatenate([sent_emd, context_embed], axis=1)          # (B, 2D)
    h1 = jax.nn.relu(e @ params["W1"] + params["b1"])
    h2 = jax.nn.relu(h1 @ params["W2"] + params["b2"])
    return h2 @ params["W3"] + params["b3"]


if __name__ == "__main__":
    VOCAB, EMB_DIM, CTX_WORDS = 1000, 32, 4
    B, SENT_LEN = 2, 8

    key = jax.random.PRNGKey(0)
    kp, ks, kc = jax.random.split(key, 3)
    params = init_params(kp, VOCAB, EMB_DIM, CTX_WORDS)

    sentence = jax.random.randint(ks, (B, SENT_LEN), 0, VOCAB, dtype=jnp.int32)
    context = jax.random.randint(kc, (B, CTX_WORDS), 0, VOCAB, dtype=jnp.int32)

    ref_f32 = reference_forward(sentence, context, params)
    # Reference with the table quantized exactly like the bf16-streamed path.
    params_q = dict(params, emb=params["emb"].astype(jnp.bfloat16).astype(jnp.float32))
    ref_q = reference_forward(sentence, context, params_q)

    # Gather path (auto default for these shapes): f32 table, exact lookups.
    out_gather = embedding_context_modeler(sentence, context, params, mode="gather")
    out_gather = jax.block_until_ready(out_gather)
    assert out_gather.shape == (B, 2)
    np.testing.assert_allclose(np.asarray(out_gather), np.asarray(ref_f32),
                               rtol=1e-3, atol=1e-3)

    # Streamed-table path: bf16 table stream, strip-mined count matmul.
    out_stream = embedding_context_modeler(sentence, context, params, mode="stream")
    out_stream = jax.block_until_ready(out_stream)
    assert out_stream.shape == (B, 2)
    np.testing.assert_allclose(np.asarray(out_stream), np.asarray(ref_q),
                               rtol=1e-3, atol=1e-3)

    print("KERNEL_OK")
</pallas_src>

<mosaic_0001>
module attributes {stable_mosaic.version = 11 : i64} {
  func.func @_ecm_gather_kernel(%arg0: i32, %arg1: memref<24xi32, #tpu.memory_space<smem>>, %arg2: memref<16x24xf32, #tpu.memory_space<vmem>>, %arg3: memref<1000x32xf32, #tpu.memory_space<any>>, %arg4: memref<32x256xf32, #tpu.memory_space<vmem>>, %arg5: memref<32x256xf32, #tpu.memory_space<vmem>>, %arg6: memref<1x256xf32, #tpu.memory_space<vmem>>, %arg7: memref<256x128xf32, #tpu.memory_space<vmem>>, %arg8: memref<1x128xf32, #tpu.memory_space<vmem>>, %arg9: memref<128x128xf32, #tpu.memory_space<vmem>>, %arg10: memref<1x128xf32, #tpu.memory_space<vmem>>, %arg11: memref<8x128xf32, #tpu.memory_space<vmem>>, %arg12: memref<24x32xf32, #tpu.memory_space<vmem>>, %arg13: memref<24x!tpu.dma_semaphore, #tpu.memory_space<semaphore_mem>>) attributes {dimension_semantics = [#tpu.dimension_semantics<arbitrary>], iteration_bounds = array<i64: 1>, scalar_prefetch = 1 : i64, scratch_operands = 2 : i64, tpu.core_type = #tpu.core_type<tc>, window_params = [{pipeline_mode = #tpu.pipeline_mode<synchronous>, transform_indices = @transform_0, window_bounds = array<i64: 16, 24>}, {}, {pipeline_mode = #tpu.pipeline_mode<synchronous>, transform_indices = @transform_2, window_bounds = array<i64: 32, 256>}, {pipeline_mode = #tpu.pipeline_mode<synchronous>, transform_indices = @transform_3, window_bounds = array<i64: 32, 256>}, {pipeline_mode = #tpu.pipeline_mode<synchronous>, transform_indices = @transform_4, window_bounds = array<i64: 1, 256>}, {pipeline_mode = #tpu.pipeline_mode<synchronous>, transform_indices = @transform_5, window_bounds = array<i64: 256, 128>}, {pipeline_mode = #tpu.pipeline_mode<synchronous>, transform_indices = @transform_6, window_bounds = array<i64: 1, 128>}, {pipeline_mode = #tpu.pipeline_mode<synchronous>, transform_indices = @transform_7, window_bounds = array<i64: 128, 128>}, {pipeline_mode = #tpu.pipeline_mode<synchronous>, transform_indices = @transform_8, window_bounds = array<i64: 1, 128>}, {pipeline_mode = #tpu.pipeline_mode<synchronous>, transform_indices = @transform_9, window_bounds = array<i64: 8, 128>}]} {
    %c0_i32 = arith.constant 0 : i32
    %c24_i32 = arith.constant 24 : i32
    %0 = arith.addi %c0_i32, %c24_i32 : i32
    %c1_i32 = arith.constant 1 : i32
    scf.for %arg14 = %c0_i32 to %0 step %c1_i32  : i32 {
      %c1_i32_30 = arith.constant 1 : i32
      %30 = arith.muli %arg14, %c1_i32_30 : i32
      %c0_i32_31 = arith.constant 0 : i32
      %31 = arith.addi %c0_i32_31, %30 : i32
      %32 = arith.index_cast %31 : i32 to index
      %33 = memref.load %arg1[%32] : memref<24xi32, #tpu.memory_space<smem>>
      %c0_i32_32 = arith.constant 0 : i32
      %34 = tpu.memref_slice %arg3[%33, %c0_i32_32] : memref<1000x32xf32, #tpu.memory_space<any>> -> memref<1x32xf32, #tpu.memory_space<any>>
      %35 = tpu.memref_squeeze %34 : memref<1x32xf32, #tpu.memory_space<any>> -> memref<32xf32, #tpu.memory_space<any>>
      %c0_i32_33 = arith.constant 0 : i32
      %36 = tpu.memref_slice %arg12[%31, %c0_i32_33] : memref<24x32xf32, #tpu.memory_space<vmem>> -> memref<1x32xf32, #tpu.memory_space<vmem>>
      %37 = tpu.memref_squeeze %36 : memref<1x32xf32, #tpu.memory_space<vmem>> -> memref<32xf32, #tpu.memory_space<vmem>>
      %38 = tpu.memref_slice %arg13[%31] : memref<24x!tpu.dma_semaphore, #tpu.memory_space<semaphore_mem>> -> memref<1x!tpu.dma_semaphore, #tpu.memory_space<semaphore_mem>>
      %39 = tpu.memref_squeeze %38 : memref<1x!tpu.dma_semaphore, #tpu.memory_space<semaphore_mem>> -> memref<!tpu.dma_semaphore, #tpu.memory_space<semaphore_mem>>
      tpu.enqueue_dma source(%35 : memref<32xf32, #tpu.memory_space<any>>) target(%37 : memref<32xf32, #tpu.memory_space<vmem>>) target_semaphore(%39 : memref<!tpu.dma_semaphore, #tpu.memory_space<semaphore_mem>>)
    }
    %c24_i32_0 = arith.constant 24 : i32
    %c0_i32_1 = arith.constant 0 : i32
    %c24_i32_2 = arith.constant 24 : i32
    %1 = arith.addi %c0_i32_1, %c24_i32_2 : i32
    %c1_i32_3 = arith.constant 1 : i32
    scf.for %arg14 = %c0_i32_1 to %1 step %c1_i32_3  : i32 {
      %c1_i32_30 = arith.constant 1 : i32
      %30 = arith.muli %arg14, %c1_i32_30 : i32
      %c0_i32_31 = arith.constant 0 : i32
      %31 = arith.addi %c0_i32_31, %30 : i32
      %c0_i32_32 = arith.constant 0 : i32
      %c0_i32_33 = arith.constant 0 : i32
      %32 = tpu.memref_slice %arg3[%c0_i32_32, %c0_i32_33] : memref<1000x32xf32, #tpu.memory_space<any>> -> memref<1x32xf32, #tpu.memory_space<any>>
      %33 = tpu.memref_squeeze %32 : memref<1x32xf32, #tpu.memory_space<any>> -> memref<32xf32, #tpu.memory_space<any>>
      %c0_i32_34 = arith.constant 0 : i32
      %34 = tpu.memref_slice %arg12[%31, %c0_i32_34] : memref<24x32xf32, #tpu.memory_space<vmem>> -> memref<1x32xf32, #tpu.memory_space<vmem>>
      %35 = tpu.memref_squeeze %34 : memref<1x32xf32, #tpu.memory_space<vmem>> -> memref<32xf32, #tpu.memory_space<vmem>>
      %36 = tpu.memref_slice %arg13[%31] : memref<24x!tpu.dma_semaphore, #tpu.memory_space<semaphore_mem>> -> memref<1x!tpu.dma_semaphore, #tpu.memory_space<semaphore_mem>>
      %37 = tpu.memref_squeeze %36 : memref<1x!tpu.dma_semaphore, #tpu.memory_space<semaphore_mem>> -> memref<!tpu.dma_semaphore, #tpu.memory_space<semaphore_mem>>
      tpu.wait_dma2 semaphore(%37 : memref<!tpu.dma_semaphore, #tpu.memory_space<semaphore_mem>>) src(%33 : memref<32xf32, #tpu.memory_space<any>>) dst(%35 : memref<32xf32, #tpu.memory_space<vmem>>)
    }
    %c24_i32_4 = arith.constant 24 : i32
    %c0 = arith.constant 0 : index
    %c0_5 = arith.constant 0 : index
    %2 = vector.load %arg2[%c0, %c0_5] : memref<16x24xf32, #tpu.memory_space<vmem>>, vector<16x24xf32>
    %c0_6 = arith.constant 0 : index
    %c0_7 = arith.constant 0 : index
    %3 = vector.load %arg12[%c0_6, %c0_7] : memref<24x32xf32, #tpu.memory_space<vmem>>, vector<24x32xf32>
    %cst = arith.constant dense<0.000000e+00> : vector<16x32xf32>
    %4 = tpu.matmul %2, %3, %cst {dimension_numbers = #tpu.dot_dimension_numbers<[1], [0], [0], [1], [0, 0, 1, 1], [], []>} : vector<16x24xf32>, vector<24x32xf32>, vector<16x32xf32> -> vector<16x32xf32>
    %5 = vector.extract_strided_slice %4 {offsets = [0, 0], sizes = [8, 32], strides = [1, 1]} : vector<16x32xf32> to vector<8x32xf32>
    %6 = vector.extract_strided_slice %4 {offsets = [8, 0], sizes = [8, 32], strides = [1, 1]} : vector<16x32xf32> to vector<8x32xf32>
    %c0_8 = arith.constant 0 : index
    %c0_9 = arith.constant 0 : index
    %7 = vector.load %arg4[%c0_8, %c0_9] : memref<32x256xf32, #tpu.memory_space<vmem>>, vector<32x256xf32>
    %cst_10 = arith.constant dense<0.000000e+00> : vector<8x256xf32>
    %8 = tpu.matmul %5, %7, %cst_10 {dimension_numbers = #tpu.dot_dimension_numbers<[1], [0], [0], [1], [0, 0, 1, 1], [], []>} : vector<8x32xf32>, vector<32x256xf32>, vector<8x256xf32> -> vector<8x256xf32>
    %c0_11 = arith.constant 0 : index
    %c0_12 = arith.constant 0 : index
    %9 = vector.load %arg5[%c0_11, %c0_12] : memref<32x256xf32, #tpu.memory_space<vmem>>, vector<32x256xf32>
    %cst_13 = arith.constant dense<0.000000e+00> : vector<8x256xf32>
    %10 = tpu.matmul %6, %9, %cst_13 {dimension_numbers = #tpu.dot_dimension_numbers<[1], [0], [0], [1], [0, 0, 1, 1], [], []>} : vector<8x32xf32>, vector<32x256xf32>, vector<8x256xf32> -> vector<8x256xf32>
    %11 = arith.addf %8, %10 : vector<8x256xf32>
    %c0_14 = arith.constant 0 : index
    %c0_15 = arith.constant 0 : index
    %12 = vector.load %arg6[%c0_14, %c0_15] : memref<1x256xf32, #tpu.memory_space<vmem>>, vector<1x256xf32>
    %13 = vector.broadcast %12 : vector<1x256xf32> to vector<8x256xf32>
    %14 = arith.addf %11, %13 : vector<8x256xf32>
    %cst_16 = arith.constant 0.000000e+00 : f32
    %15 = vector.broadcast %cst_16 : f32 to vector<8x256xf32>
    %16 = arith.maximumf %14, %15 : vector<8x256xf32>
    %c0_17 = arith.constant 0 : index
    %c0_18 = arith.constant 0 : index
    %17 = vector.load %arg7[%c0_17, %c0_18] : memref<256x128xf32, #tpu.memory_space<vmem>>, vector<256x128xf32>
    %cst_19 = arith.constant dense<0.000000e+00> : vector<8x128xf32>
    %18 = tpu.matmul %16, %17, %cst_19 {dimension_numbers = #tpu.dot_dimension_numbers<[1], [0], [0], [1], [0, 0, 1, 1], [], []>} : vector<8x256xf32>, vector<256x128xf32>, vector<8x128xf32> -> vector<8x128xf32>
    %c0_20 = arith.constant 0 : index
    %c0_21 = arith.constant 0 : index
    %19 = vector.load %arg8[%c0_20, %c0_21] : memref<1x128xf32, #tpu.memory_space<vmem>>, vector<1x128xf32>
    %20 = vector.broadcast %19 : vector<1x128xf32> to vector<8x128xf32>
    %21 = arith.addf %18, %20 : vector<8x128xf32>
    %cst_22 = arith.constant 0.000000e+00 : f32
    %22 = vector.broadcast %cst_22 : f32 to vector<8x128xf32>
    %23 = arith.maximumf %21, %22 : vector<8x128xf32>
    %c0_23 = arith.constant 0 : index
    %c0_24 = arith.constant 0 : index
    %24 = vector.load %arg9[%c0_23, %c0_24] : memref<128x128xf32, #tpu.memory_space<vmem>>, vector<128x128xf32>
    %cst_25 = arith.constant dense<0.000000e+00> : vector<8x128xf32>
    %25 = tpu.matmul %23, %24, %cst_25 {dimension_numbers = #tpu.dot_dimension_numbers<[1], [0], [0], [1], [0, 0, 1, 1], [], []>} : vector<8x128xf32>, vector<128x128xf32>, vector<8x128xf32> -> vector<8x128xf32>
    %c0_26 = arith.constant 0 : index
    %c0_27 = arith.constant 0 : index
    %26 = vector.load %arg10[%c0_26, %c0_27] : memref<1x128xf32, #tpu.memory_space<vmem>>, vector<1x128xf32>
    %27 = vector.broadcast %26 : vector<1x128xf32> to vector<8x128xf32>
    %28 = arith.addf %25, %27 : vector<8x128xf32>
    %c0_28 = arith.constant 0 : index
    %c0_29 = arith.constant 0 : index
    %29 = vector.load %arg11[%c0_28, %c0_29] : memref<8x128xf32, #tpu.memory_space<vmem>>, vector<8x128xf32>
    tpu.vector_store %arg11[%c0_28, %c0_29], %28 {strides = array<i32>} : memref<8x128xf32, #tpu.memory_space<vmem>>, vector<8x128xf32>,
    return
  }
  func.func @transform_0(%arg0: i32, %arg1: memref<24xi32, #tpu.memory_space<smem>>) -> (i32, i32) {
    %c0_i32 = arith.constant 0 : i32
    %c0_i32_0 = arith.constant 0 : i32
    %c0_i32_1 = arith.constant 0 : i32
    return %c0_i32, %c0_i32_0 : i32, i32
  }
  func.func @transform_2(%arg0: i32, %arg1: memref<24xi32, #tpu.memory_space<smem>>) -> (i32, i32) {
    %c0_i32 = arith.constant 0 : i32
    %c0_i32_0 = arith.constant 0 : i32
    %c0_i32_1 = arith.constant 0 : i32
    return %c0_i32, %c0_i32_0 : i32, i32
  }
  func.func @transform_3(%arg0: i32, %arg1: memref<24xi32, #tpu.memory_space<smem>>) -> (i32, i32) {
    %c0_i32 = arith.constant 0 : i32
    %c0_i32_0 = arith.constant 0 : i32
    %c0_i32_1 = arith.constant 0 : i32
    return %c0_i32, %c0_i32_0 : i32, i32
  }
  func.func @transform_4(%arg0: i32, %arg1: memref<24xi32, #tpu.memory_space<smem>>) -> (i32, i32) {
    %c0_i32 = arith.constant 0 : i32
    %c0_i32_0 = arith.constant 0 : i32
    %c0_i32_1 = arith.constant 0 : i32
    return %c0_i32, %c0_i32_0 : i32, i32
  }
  func.func @transform_5(%arg0: i32, %arg1: memref<24xi32, #tpu.memory_space<smem>>) -> (i32, i32) {
    %c0_i32 = arith.constant 0 : i32
    %c0_i32_0 = arith.constant 0 : i32
    %c0_i32_1 = arith.constant 0 : i32
    return %c0_i32, %c0_i32_0 : i32, i32
  }
  func.func @transform_6(%arg0: i32, %arg1: memref<24xi32, #tpu.memory_space<smem>>) -> (i32, i32) {
    %c0_i32 = arith.constant 0 : i32
    %c0_i32_0 = arith.constant 0 : i32
    %c0_i32_1 = arith.constant 0 : i32
    return %c0_i32, %c0_i32_0 : i32, i32
  }
  func.func @transform_7(%arg0: i32, %arg1: memref<24xi32, #tpu.memory_space<smem>>) -> (i32, i32) {
    %c0_i32 = arith.constant 0 : i32
    %c0_i32_0 = arith.constant 0 : i32
    %c0_i32_1 = arith.constant 0 : i32
    return %c0_i32, %c0_i32_0 : i32, i32
  }
  func.func @transform_8(%arg0: i32, %arg1: memref<24xi32, #tpu.memory_space<smem>>) -> (i32, i32) {
    %c0_i32 = arith.constant 0 : i32
    %c0_i32_0 = arith.constant 0 : i32
    %c0_i32_1 = arith.constant 0 : i32
    return %c0_i32, %c0_i32_0 : i32, i32
  }
  func.func @transform_9(%arg0: i32, %arg1: memref<24xi32, #tpu.memory_space<smem>>) -> (i32, i32) {
    %c0_i32 = arith.constant 0 : i32
    %c0_i32_0 = arith.constant 0 : i32
    %c0_i32_1 = arith.constant 0 : i32
    return %c0_i32, %c0_i32_0 : i32, i32
  }
}

</mosaic_0001>

<bundles_post_ra>
// kernel: tpu_custom_call.1
= control target key start
LH: loop header
LB: loop body
LE: loop exit
PB: predicated region body
PF: predicated region fallthrough
CT: control target
= control target key end

     0   :  { %s668_s16 = smov [#allocation5]   ;;  %s945_s0 = inlined_call_operand.vmem [shape: s32[24], index: 0, kind: input, shape index: {}]   ;;  %s946_s1 = inlined_call_operand.vmem [shape: f32[16,24], index: 1, kind: input, shape index: {}]   ;;  %s947_s2 = inlined_call_operand.vmem [shape: f32[1000,32], index: 2, kind: input, shape index: {}]   ;;  %s948_s3 = inlined_call_operand.vmem [shape: f32[32,256], index: 3, kind: input, shape index: {}]   ;;  %s949_s4 = inlined_call_operand.vmem [shape: f32[32,256], index: 4, kind: input, shape index: {}]   ;;  %s950_s5 = inlined_call_operand.vmem [shape: f32[1,256], index: 5, kind: input, shape index: {}]   ;;  %s951_s6 = inlined_call_operand.vmem [shape: f32[256,128], index: 6, kind: input, shape index: {}]   ;;  %s952_s7 = inlined_call_operand.vmem [shape: f32[1,128], index: 7, kind: input, shape index: {}]   ;;  %s953_s8 = inlined_call_operand.vmem [shape: f32[128,128], index: 8, kind: input, shape index: {}]   ;;  %s954_s9 = inlined_call_operand.vmem [shape: f32[1,128], index: 9, kind: input, shape index: {}]   ;;  %s955_s10 = inlined_call_operand.hbm [shape: f32[8,128], index: 10, kind: output, shape index: {}]  }
   0x1   :  { %s16_s15 = sshll.u32 %s945_s0, 4  ;;  %s17_s15 = int_to_ptr.vmem [resolvable:$true] %s16_s15 }
   0x2   :  { %19 = dma.vmem_to_smem %s17_s15, 16, %s668_s16, [#allocation4] }
   0x3   :  { %654 = dma.done.wait [#allocation4], 16 }
   0x4   :  { %655 = vsyncadd [#allocation4], 4294967280 }
   0x5   :  { %22 = sfence }
   0x6   :  { %23 = vsyncpa [#allocation7], 0  ;;  %s660_s17 = smov 0  }
   0x7 LB: > { %s46_s18 = sld [smem:[#allocation5 + %s662_s17]]  ;;  %s48_s22 = scalar_lea.vmem [#allocation2], %s662_s17  ;;  %s662_s17 = sphi %s660_s17, %s45_s17  }
   0x8   : > { %s49_s0 = scalar_lea.sflag [#allocation3], %s662_s17 }
   0xd   : > { %s47_s21 = scalar_lea.vmem %s947_s2, %s46_s18 }
   0xe   : > { %v64_v0 = vld [vmem:[%s47_s21] sm:$0x1] }
   0xf   : > { %65 = vst [vmem:[%s48_s22] sm:$0x1] %v64_v0 }
  0x10   : > { %83 = vsyncadd %s49_s0, 16  ;;  %s45_s17 = sadd.s32 1, %s662_s17  }
  0x11   : > { %p42_p0 = scmp.ge.s32.totalorder %s45_s17, 24  }
  0x12   :  { %s664_s23 = smov (%p42_p0), 0  }
  0x13   :  { %44 = sbr.rel (!%p42_p0) target bundleno = 7 (0x7), region = 127 }
  0x18 LB: > { %s90_s24 = scalar_lea.sflag [#allocation3], %s666_s23  ;;  %s666_s23 = sphi %s664_s23, %s89_s23  }
  0x19   : > { %656 = dma.done.wait %s90_s24, 16 }
  0x1a   : > { %657 = vsyncadd %s90_s24, 4294967280  ;;  %s89_s23 = sadd.s32 1, %s666_s23  }
  0x1b   : > { %p86_p1 = scmp.ge.s32.totalorder %s89_s23, 24  }
  0x1c   :  { %v97_v1 = vld [vmem:[#allocation2 + $0x10] sm:$0xff] (%p86_p1)  ;;  %v96_v2 = vld [vmem:[#allocation2 + $0x8] sm:$0xff] (%p86_p1)  ;;  %v95_v3 = vld [vmem:[#allocation2] sm:$0xff] (%p86_p1)  ;;  %vm98_vm0 = vcmask (%p86_p1), 195584   ;;  %vm144_vm1 = vcmask (%p86_p1), 261120   ;;  %s669_s15 = smov (%p86_p1), [#allocation6]  }
  0x1d   :  { %88 = sbr.rel (!%p86_p1) target bundleno = 24 (0x18), region = 138  ;;  %118 = vmatpush.msra.mxu0 (%p86_p1), %v97_v1  ;;  %v93_v4 = vld [vmem:[%s946_s1] sm:$0xff] (%p86_p1)  ;;  %v94_v5 = vld [vmem:[%s946_s1 + $0x8] sm:$0xff] (%p86_p1)  ;;  %v142_v6 = vld [vmem:[%s949_s4 + $0x30] sm:$0xff] (%p86_p1)  ;;  %s364_s1 = sshll.u32 (%p86_p1), %s669_s15, 4  ;;  %s365_s1 = int_to_ptr.vmem [resolvable:$true] %s364_s1 }
  0x1e   :  { %v140_v7 = vld [vmem:[%s949_s4 + $0x20] sm:$0xff] (%p86_p1)  ;;  %160 = vmatpush.msra.mxu1 (%p86_p1), %v142_v6  ;;  %v138_v8 = vld [vmem:[%s949_s4 + $0x10] sm:$0xff] (%p86_p1)  ;;  %v143_v10 = vld [vmem:[%s949_s4 + $0x38] sm:$0xff] (%p86_p1) }
  0x1f   :  { %119 = vmatpush.msra.mxu0 (%p86_p1), %v96_v2  ;;  %v136_v9 = vld [vmem:[%s949_s4] sm:$0xff] (%p86_p1)  ;;  %v141_v11 = vld [vmem:[%s949_s4 + $0x28] sm:$0xff] (%p86_p1)  ;;  %v139_v12 = vld [vmem:[%s949_s4 + $0x18] sm:$0xff] (%p86_p1) }
  0x20   :  { %161 = vmatpush.msra.mxu1 (%p86_p1), %v140_v7  ;;  %v137_v13 = vld [vmem:[%s949_s4 + $0x8] sm:$0xff] (%p86_p1)  ;;  %v256_v15 = vld [vmem:[%s951_s6 + $0x78] sm:$0xff] (%p86_p1)  ;;  %v255_v16 = vld [vmem:[%s951_s6 + $0x70] sm:$0xff] (%p86_p1) }
  0x21   :  { %120 = vmatpush.msra.mxu0 (%p86_p1), %v95_v3  ;;  %v254_v17 = vld [vmem:[%s951_s6 + $0x68] sm:$0xff] (%p86_p1)  ;;  %v253_v18 = vld [vmem:[%s951_s6 + $0x60] sm:$0xff] (%p86_p1)  ;;  %v134_v19 = vld [vmem:[%s948_s3 + $0x30] sm:$0xff] (%p86_p1) }
  0x22   :  { %560 = vmatmul.msk.f32.vlgmr.msra.gmra.mxu0 %vm98_vm0, %v93_v4  ;;  %162 = vmatpush.msra.mxu1 %v138_v8  ;;  %v132_v21 = vld [vmem:[%s948_s3 + $0x20] sm:$0xff]  ;;  %v130_v22 = vld [vmem:[%s948_s3 + $0x10] sm:$0xff]  ;;  %v135_v24 = vld [vmem:[%s948_s3 + $0x38] sm:$0xff] }
  0x23   :  { %277 = vmatpush.msrb.mxu0 %v256_v15  ;;  %v128_v23 = vld [vmem:[%s948_s3] sm:$0xff]  ;;  %v133_v25 = vld [vmem:[%s948_s3 + $0x28] sm:$0xff]  ;;  %v131_v26 = vld [vmem:[%s948_s3 + $0x18] sm:$0xff] }
  0x24   :  { %163 = vmatpush.msra.mxu1 %v136_v9  ;;  %v129_v27 = vld [vmem:[%s948_s3 + $0x8] sm:$0xff]  ;;  %v252_v28 = vld [vmem:[%s951_s6 + $0x58] sm:$0xff]  ;;  %v251_v30 = vld [vmem:[%s951_s6 + $0x50] sm:$0xff] }
  0x25   :  { %278 = vmatpush.msrb.mxu0 %v255_v16  ;;  %v272_v29 = vld [vmem:[%s951_s6 + $0xf8] sm:$0xff]  ;;  %v271_v31 = vld [vmem:[%s951_s6 + $0xf0] sm:$0xff]  ;;  %v250_v32 = vld [vmem:[%s951_s6 + $0x48] sm:$0xff] }
  0x26   :  { %180 = vmatpush.msrb.mxu1 %v143_v10  ;;  %297 = vmatpush.msra.mxu2 %v272_v29  ;;  %v270_v33 = vld [vmem:[%s951_s6 + $0xe8] sm:$0xff]  ;;  %v249_v34 = vld [vmem:[%s951_s6 + $0x40] sm:$0xff]  ;;  %v248_v36 = vld [vmem:[%s951_s6 + $0x38] sm:$0xff] }
  0x27   :  { %279 = vmatpush.msrb.mxu0 %v254_v17  ;;  %v269_v35 = vld [vmem:[%s951_s6 + $0xe0] sm:$0xff]  ;;  %v268_v37 = vld [vmem:[%s951_s6 + $0xd8] sm:$0xff]  ;;  %v247_v38 = vld [vmem:[%s951_s6 + $0x30] sm:$0xff] }
  0x28   :  { %181 = vmatpush.msrb.mxu1 %v141_v11  ;;  %298 = vmatpush.msra.mxu2 %v271_v31  ;;  %v267_v39 = vld [vmem:[%s951_s6 + $0xd0] sm:$0xff]  ;;  %v246_v40 = vld [vmem:[%s951_s6 + $0x28] sm:$0xff]  ;;  %v245_v42 = vld [vmem:[%s951_s6 + $0x20] sm:$0xff] }
  0x29   :  { %280 = vmatpush.msrb.mxu0 %v253_v18  ;;  %v266_v41 = vld [vmem:[%s951_s6 + $0xc8] sm:$0xff]  ;;  %v265_v43 = vld [vmem:[%s951_s6 + $0xc0] sm:$0xff]  ;;  %v244_v44 = vld [vmem:[%s951_s6 + $0x18] sm:$0xff] }
  0x2a   :  { %561 = vmatmul.msk.f32.gmra.mxu0 %vm98_vm0, %v94_v5  ;;  %182 = vmatpush.msrb.mxu1 %v139_v12  ;;  %v264_v45 = vld [vmem:[%s951_s6 + $0xb8] sm:$0xff]  ;;  %v243_v46 = vld [vmem:[%s951_s6 + $0x10] sm:$0xff]  ;;  %v242_v48 = vld [vmem:[%s951_s6 + $0x8] sm:$0xff] }
  0x2b   :  { %281 = vmatpush.msrb.mxu0 %v252_v28  ;;  %299 = vmatpush.msra.mxu2 %v270_v33  ;;  %v263_v47 = vld [vmem:[%s951_s6 + $0xb0] sm:$0xff]  ;;  %v262_v49 = vld [vmem:[%s951_s6 + $0xa8] sm:$0xff]  ;;  %v241_v50 = vld [vmem:[%s951_s6] sm:$0xff] }
  0x2c   :  { %183 = vmatpush.msrb.mxu1 %v137_v13  ;;  %v261_v51 = vld [vmem:[%s951_s6 + $0xa0] sm:$0xff]  ;;  %v260_v52 = vld [vmem:[%s951_s6 + $0x98] sm:$0xff]  ;;  %v259_v53 = vld [vmem:[%s951_s6 + $0x90] sm:$0xff] }
  0x2d   :  { %282 = vmatpush.msrb.mxu0 %v251_v30  ;;  %300 = vmatpush.msra.mxu2 %v269_v35  ;;  %v258_v54 = vld [vmem:[%s951_s6 + $0x88] sm:$0xff]  ;;  %v257_v55 = vld [vmem:[%s951_s6 + $0x80] sm:$0xff]  ;;  %v333_v56 = vld [vmem:[%s953_s8 + $0x78] sm:$0xff] }
  0x2e   :  { %v332_v57 = vld [vmem:[%s953_s8 + $0x70] sm:$0xff]  ;;  %338 = vmatpush.msra.mxu3 %v333_v56  ;;  %v331_v59 = vld [vmem:[%s953_s8 + $0x68] sm:$0xff]  ;;  %v330_v60 = vld [vmem:[%s953_s8 + $0x60] sm:$0xff] }
  0x2f   :  { %283 = vmatpush.msrb.mxu0 %v250_v32  ;;  %301 = vmatpush.msra.mxu2 %v268_v37  ;;  %v329_v61 = vld [vmem:[%s953_s8 + $0x58] sm:$0xff]  ;;  %v328_v62 = vld [vmem:[%s953_s8 + $0x50] sm:$0xff]  ;;  %v231_v0 = vld [vmem:[%s950_s5] sm:$0x3] }
  0x30   :  { %339 = vmatpush.msra.mxu3 %v332_v57  ;;  %v233_v1 = vperm.slane %v231_v0, 0  ;;  %v234_v6 = vperm.slane %v231_v0, 1  ;;  %v327_v11 = vld [vmem:[%s953_s8 + $0x48] sm:$0xff]  ;;  %v326_v12 = vld [vmem:[%s953_s8 + $0x40] sm:$0xff]  ;;  %v325_v13 = vld [vmem:[%s953_s8 + $0x38] sm:$0xff] }
  0x31   :  { %284 = vmatpush.msrb.mxu0 %v249_v34  ;;  %302 = vmatpush.msra.mxu2 %v267_v39  ;;  %v323_v15 = vld [vmem:[%s953_s8 + $0x28] sm:$0xff]  ;;  %v322_v16 = vld [vmem:[%s953_s8 + $0x20] sm:$0xff]  ;;  %v321_v17 = vld [vmem:[%s953_s8 + $0x18] sm:$0xff] }
  0x32   :  { %340 = vmatpush.msra.mxu3 %v331_v59  ;;  %v320_v18 = vld [vmem:[%s953_s8 + $0x10] sm:$0xff] }
  0x33   :  { %285 = vmatpush.msrb.mxu0 %v248_v36  ;;  %303 = vmatpush.msra.mxu2 %v266_v41 }
  0x34   :  { %341 = vmatpush.msra.mxu3 %v330_v60 }
  0x35   :  { %286 = vmatpush.msrb.mxu0 %v247_v38  ;;  %304 = vmatpush.msra.mxu2 %v265_v43 }
  0x36   :  { %342 = vmatpush.msra.mxu3 %v329_v61 }
  0x37   :  { %287 = vmatpush.msrb.mxu0 %v246_v40  ;;  %305 = vmatpush.msra.mxu2 %v264_v45 }
  0x38   :  { %343 = vmatpush.msra.mxu3 %v328_v62 }
  0x39   :  { %288 = vmatpush.msrb.mxu0 %v245_v42  ;;  %306 = vmatpush.msra.mxu2 %v263_v47 }
  0x3a   :  { %344 = vmatpush.msra.mxu3 %v327_v11 }
  0x3b   :  { %289 = vmatpush.msrb.mxu0 %v244_v44  ;;  %307 = vmatpush.msra.mxu2 %v262_v49 }
  0x3c   :  { %345 = vmatpush.msra.mxu3 %v326_v12 }
  0x3d   :  { %290 = vmatpush.msrb.mxu0 %v243_v46  ;;  %308 = vmatpush.msra.mxu2 %v261_v51 }
  0x3e   :  { %346 = vmatpush.msra.mxu3 %v325_v13 }
  0x3f   :  { %291 = vmatpush.msrb.mxu0 %v242_v48  ;;  %309 = vmatpush.msra.mxu2 %v260_v52 }
  0x41   :  { %292 = vmatpush.msrb.mxu0 %v241_v50  ;;  %310 = vmatpush.msra.mxu2 %v259_v53 }
  0x43   :  { %311 = vmatpush.msra.mxu2 %v258_v54 }
  0x45   :  { %312 = vmatpush.msra.mxu2 %v257_v55 }
  0x9f   :  { %v122_v14 = vpop.f32.mrf.mxu0 }
  0xa7   :  { %v125_v20 = vpop.f32.mrf.mxu0 }
  0xa8   :  { %562 = vmatmul.msk.f32.vlgmr.msra.gmra.mxu1 %vm144_vm1, %v125_v20 }
  0xa9   :  { %203 = vmatpush.msra.mxu1 %v134_v19  ;;  %v319_v19 = vld [vmem:[%s953_s8 + $0x8] sm:$0xff] }
  0xab   :  { %204 = vmatpush.msra.mxu1 %v132_v21  ;;  %v608_v21 = vld [vmem:[%s952_s7] ss:$0 sm:$0xff] }
  0xad   :  { %205 = vmatpush.msra.mxu1 %v130_v22 }
  0xaf   :  { %206 = vmatpush.msra.mxu1 %v128_v23 }
  0xb0   :  { %563 = vmatmul.msk.f32.vlgmr.msrb.gmra.mxu1 %vm144_vm1, %v125_v20  ;;  %v318_v20 = vld [vmem:[%s953_s8] sm:$0xff] }
  0xb1   :  { %223 = vmatpush.msrb.mxu1 %v135_v24 }
  0xb3   :  { %224 = vmatpush.msrb.mxu1 %v133_v25 }
  0xb5   :  { %225 = vmatpush.msrb.mxu1 %v131_v26 }
  0xb7   :  { %226 = vmatpush.msrb.mxu1 %v129_v27  ;;  %v609_v27 = vld [vmem:[%s954_s9] ss:$0 sm:$0xff] }
  0xb8   :  { %564 = vmatmul.msk.f32.vlgmr.msra.gmra.mxu1 %vm144_vm1, %v122_v14 }
  0xc0   :  { %565 = vmatmul.msk.f32.vlgmr.msrb.gmra.mxu1 %vm144_vm1, %v122_v14  ;;  %v324_v14 = vld [vmem:[%s953_s8 + $0x30] sm:$0xff]  ;;  %s366_s8 = sshll.u32 %s955_s10, 4  ;;  %s367_s8 = int_to_ptr.hbm [resolvable:$true] %s366_s8 }
  0xc1   :  { %347 = vmatpush.msra.mxu3 %v324_v14 }
  0xc3   :  { %348 = vmatpush.msra.mxu3 %v323_v15 }
  0xc5   :  { %349 = vmatpush.msra.mxu3 %v322_v16 }
  0xc7   :  { %350 = vmatpush.msra.mxu3 %v321_v17 }
  0xc9   :  { %351 = vmatpush.msra.mxu3 %v320_v18 }
  0xcb   :  { %352 = vmatpush.msra.mxu3 %v319_v19 }
  0xcd   :  { %353 = vmatpush.msra.mxu3 %v318_v20 }
 0x125   :  { %v165_v58 = vpop.f32.mrf.mxu1 }
 0x12d   :  { %v185_v63 = vpop.f32.mrf.mxu1 }
 0x135   :  { %v208_v2 = vpop.f32.mrf.mxu1 }
 0x136   :  { %v209_v3 = vadd.f32 %v208_v2, %v165_v58 }
 0x138   :  { %v237_v4 = vadd.f32 %v233_v1, %v209_v3 }
 0x13a   :  { %v239_v5 = vmax.f32 %v237_v4, 0.0 }
 0x13c   :  { %293 = vmatmul.f32.vlgmr.msrb.gmra.mxu0 %v239_v5 }
 0x13d   :  { %v228_v7 = vpop.f32.mrf.mxu1 }
 0x13e   :  { %v229_v8 = vadd.f32 %v228_v7, %v185_v63 }
 0x140   :  { %v238_v9 = vadd.f32 %v234_v6, %v229_v8 }
 0x142   :  { %v240_v10 = vmax.f32 %v238_v9, 0.0 }
 0x144   :  { %313 = vmatmul.f32.vlgmr.msra.gmra.mxu2 %v240_v10 }
 0x1b9   :  { %v294_v22 = vpop.f32.mrf.mxu0 }
 0x1ba   :  { %v295_v23 = vadd.f32 %v608_v21, %v294_v22 }
 0x1c7   :  { %v314_v24 = vpop.f32.mrf.mxu2 }
 0x1c8   :  { %v315_v25 = vadd.f32 %v314_v24, %v295_v23 }
 0x1ca   :  { %v317_v26 = vmax.f32 %v315_v25, 0.0 }
 0x1cc   :  { %354 = vmatmul.f32.vlgmr.msra.gmra.mxu3 %v317_v26 }
 0x24f   :  { %v355_v28 = vpop.f32.mrf.mxu3 }
 0x250   :  { %v356_v29 = vadd.f32 %v609_v27, %v355_v28 }
 0x252   :  { %358 = vst [vmem:[#allocation6] sm:$0xff] %v356_v29 }
 0x253   :  { %369 = dma.vmem_to_hbm [thread:$0]  %s365_s1, 128, %s367_s8, [#allocation7]  }
 0x254   :  { %658 = dma.done.wait [#allocation7], 128  }
 0x255   :  { %659 = vsyncadd [#allocation7], 4294967168 }
 0x256   :  { %374 = vsyncpa [#allocation7], 1 }
 0x257   :  { %375 = vsyncmov [#allocation3] }
 0x25a   :  { %s376_s7 = vpop.sfrf %375 }
 0x25b   :  { %p566_p2 = scmp.ne.s32.totalorder %s376_s7, 0 }
 0x25d   :  { %380 = shalt.err (%p566_p2)  }
 0x25e   :  { %382 = vsyncmov [#allocation3 + $0x1] }
 0x261   :  { %s383_s9 = vpop.sfrf %382 }
 0x262   :  { %p567_p3 = scmp.ne.s32.totalorder %s383_s9, 0 }
 0x264   :  { %387 = shalt.err (%p567_p3)  }
 0x265   :  { %389 = vsyncmov [#allocation3 + $0x2] }
 0x268   :  { %s390_s18 = vpop.sfrf %389 }
 0x269   :  { %p568_p4 = scmp.ne.s32.totalorder %s390_s18, 0 }
 0x26b   :  { %394 = shalt.err (%p568_p4)  }
 0x26c   :  { %396 = vsyncmov [#allocation3 + $0x3] }
 0x26f   :  { %s397_s10 = vpop.sfrf %396 }
 0x270   :  { %p569_p5 = scmp.ne.s32.totalorder %s397_s10, 0 }
 0x272   :  { %401 = shalt.err (%p569_p5)  }
 0x273   :  { %403 = vsyncmov [#allocation3 + $0x4] }
 0x276   :  { %s404_s19 = vpop.sfrf %403 }
 0x277   :  { %p570_p6 = scmp.ne.s32.totalorder %s404_s19, 0 }
 0x279   :  { %408 = shalt.err (%p570_p6)  }
 0x27a   :  { %410 = vsyncmov [#allocation3 + $0x5] }
 0x27d   :  { %s411_s20 = vpop.sfrf %410 }
 0x27e   :  { %p571_p7 = scmp.ne.s32.totalorder %s411_s20, 0 }
 0x280   :  { %415 = shalt.err (%p571_p7)  }
 0x281   :  { %417 = vsyncmov [#allocation3 + $0x6] }
 0x284   :  { %s418_s5 = vpop.sfrf %417 }
 0x285   :  { %p572_p8 = scmp.ne.s32.totalorder %s418_s5, 0 }
 0x287   :  { %422 = shalt.err (%p572_p8)  }
 0x288   :  { %424 = vsyncmov [#allocation3 + $0x7] }
 0x28b   :  { %s425_s21 = vpop.sfrf %424 }
 0x28c   :  { %p573_p9 = scmp.ne.s32.totalorder %s425_s21, 0 }
 0x28e   :  { %429 = shalt.err (%p573_p9)  }
 0x28f   :  { %431 = vsyncmov [#allocation3 + $0x8] }
 0x292   :  { %s432_s22 = vpop.sfrf %431 }
 0x293   :  { %p574_p10 = scmp.ne.s32.totalorder %s432_s22, 0 }
 0x295   :  { %436 = shalt.err (%p574_p10)  }
 0x296   :  { %438 = vsyncmov [#allocation3 + $0x9] }
 0x299   :  { %s439_s0 = vpop.sfrf %438 }
 0x29a   :  { %p575_p11 = scmp.ne.s32.totalorder %s439_s0, 0 }
 0x29c   :  { %443 = shalt.err (%p575_p11)  }
 0x29d   :  { %445 = vsyncmov [#allocation3 + $0xa] }
 0x2a0   :  { %s446_s23 = vpop.sfrf %445 }
 0x2a1   :  { %p576_p12 = scmp.ne.s32.totalorder %s446_s23, 0 }
 0x2a3   :  { %450 = shalt.err (%p576_p12)  }
 0x2a4   :  { %452 = vsyncmov [#allocation3 + $0xb] }
 0x2a7   :  { %s453_s24 = vpop.sfrf %452 }
 0x2a8   :  { %p577_p13 = scmp.ne.s32.totalorder %s453_s24, 0 }
 0x2aa   :  { %457 = shalt.err (%p577_p13)  }
 0x2ab   :  { %459 = vsyncmov [#allocation3 + $0xc] }
 0x2ae   :  { %s460_s25 = vpop.sfrf %459 }
 0x2af   :  { %p578_p0 = scmp.ne.s32.totalorder %s460_s25, 0 }
 0x2b1   :  { %464 = shalt.err (%p578_p0)  }
 0x2b2   :  { %466 = vsyncmov [#allocation3 + $0xd] }
 0x2b5   :  { %s467_s26 = vpop.sfrf %466 }
 0x2b6   :  { %p579_p1 = scmp.ne.s32.totalorder %s467_s26, 0 }
 0x2b8   :  { %471 = shalt.err (%p579_p1)  }
 0x2b9   :  { %473 = vsyncmov [#allocation3 + $0xe] }
 0x2bc   :  { %s474_s2 = vpop.sfrf %473 }
 0x2bd   :  { %p580_p2 = scmp.ne.s32.totalorder %s474_s2, 0 }
 0x2bf   :  { %478 = shalt.err (%p580_p2)  }
 0x2c0   :  { %480 = vsyncmov [#allocation3 + $0xf] }
 0x2c3   :  { %s481_s3 = vpop.sfrf %480 }
 0x2c4   :  { %p581_p3 = scmp.ne.s32.totalorder %s481_s3, 0 }
 0x2c6   :  { %485 = shalt.err (%p581_p3)  }
 0x2c7   :  { %487 = vsyncmov [#allocation3 + $0x10] }
 0x2ca   :  { %s488_s27 = vpop.sfrf %487 }
 0x2cb   :  { %p582_p4 = scmp.ne.s32.totalorder %s488_s27, 0 }
 0x2cd   :  { %492 = shalt.err (%p582_p4)  }
 0x2ce   :  { %494 = vsyncmov [#allocation3 + $0x11] }
 0x2d1   :  { %s495_s28 = vpop.sfrf %494 }
 0x2d2   :  { %p583_p5 = scmp.ne.s32.totalorder %s495_s28, 0 }
 0x2d4   :  { %499 = shalt.err (%p583_p5)  }
 0x2d5   :  { %501 = vsyncmov [#allocation3 + $0x12] }
 0x2d8   :  { %s502_s4 = vpop.sfrf %501 }
 0x2d9   :  { %p584_p6 = scmp.ne.s32.totalorder %s502_s4, 0 }
 0x2db   :  { %506 = shalt.err (%p584_p6)  }
 0x2dc   :  { %508 = vsyncmov [#allocation3 + $0x13] }
 0x2df   :  { %s509_s29 = vpop.sfrf %508 }
 0x2e0   :  { %p585_p7 = scmp.ne.s32.totalorder %s509_s29, 0 }
 0x2e2   :  { %513 = shalt.err (%p585_p7)  }
 0x2e3   :  { %515 = vsyncmov [#allocation3 + $0x14] }
 0x2e6   :  { %s516_s30 = vpop.sfrf %515 }
 0x2e7   :  { %p586_p8 = scmp.ne.s32.totalorder %s516_s30, 0 }
 0x2e9   :  { %520 = shalt.err (%p586_p8)  }
 0x2ea   :  { %522 = vsyncmov [#allocation3 + $0x15] }
 0x2ed   :  { %s523_s11 = vpop.sfrf %522 }
 0x2ee   :  { %p587_p9 = scmp.ne.s32.totalorder %s523_s11, 0 }
 0x2f0   :  { %527 = shalt.err (%p587_p9)  }
 0x2f1   :  { %529 = vsyncmov [#allocation3 + $0x16] }
 0x2f4   :  { %s530_s12 = vpop.sfrf %529 }
 0x2f5   :  { %p588_p10 = scmp.ne.s32.totalorder %s530_s12, 0 }
 0x2f7   :  { %534 = shalt.err (%p588_p10)  }
 0x2f8   :  { %536 = vsyncmov [#allocation3 + $0x17] }
 0x2fb   :  { %s537_s6 = vpop.sfrf %536 }
 0x2fc   :  { %p589_p11 = scmp.ne.s32.totalorder %s537_s6, 0 }
 0x2fe   :  { %541 = shalt.err (%p589_p11)  }

</bundles_post_ra>
